<compile_context>
chip_gen: v7x
topology: tpu7x:2x2x1
jax: 0.10.0
libtpu: 0.0.40
codegen_flags: <defaults>
</compile_context>

<pallas_src>
import jax
import jax.numpy as jnp
from jax.experimental import pallas as pl
from jax.experimental.pallas import tpu as pltpu

EPS = 1e-5
NEG_SLOPE = 0.2


def _round_up(a, b):
    return (a + b - 1) // b * b


def _make_matmul_stats_kernel(tile_m, m_actual):
    """Pass 1: (tile_m, Kp) @ (Kp, Cp) + bias -> y tile; accumulate channel sum/sumsq."""

    def kernel(p_ref, w_ref, b_ref, y_ref, sum_ref, sq_ref):
        i = pl.program_id(0)

        @pl.when(i == 0)
        def _():
            sum_ref[...] = jnp.zeros_like(sum_ref)
            sq_ref[...] = jnp.zeros_like(sq_ref)

        # MXU matmul: bf16 operands, f32 accumulation.
        y = jnp.dot(p_ref[...], w_ref[...], preferred_element_type=jnp.float32)
        y = y + b_ref[...]                     # conv bias, broadcast (1, Cp)
        y_ref[...] = y

        # BatchNorm batch statistics must be global over exactly M rows: mask the
        # zero-padded rows (which would otherwise contribute `bias` to the stats).
        row_ids = i * tile_m + jax.lax.broadcasted_iota(jnp.int32, y.shape, 0)
        ym = jnp.where(row_ids < m_actual, y, 0.0)
        sum_ref[...] += jnp.sum(ym, axis=0, keepdims=True)
        sq_ref[...] += jnp.sum(ym * ym, axis=0, keepdims=True)

    return kernel


def _bn_lrelu_kernel(y_ref, scale_ref, shift_ref, o_ref):
    """Pass 2: z = y*scale + shift ; LeakyReLU(0.2). Lane-dense, fully parallel."""
    z = y_ref[...] * scale_ref[...] + shift_ref[...]
    o_ref[...] = jnp.where(z >= 0, z, NEG_SLOPE * z)


def pyramidconv2d(x_nchw, weight_oihw, bias, gamma, beta):
    """x_nchw: (N, Cin, H, W); weight_oihw: (Cout, Cin, 4, 4). Returns NCHW f32."""
    N, Cin, H, W = x_nchw.shape
    Cout = weight_oihw.shape[0]
    KH = KW = 4
    OH = (H + 2 - KH) // 2 + 1
    OW = (W + 2 - KW) // 2 + 1
    M = N * OH * OW
    K = KH * KW * Cin

    # Lane-dense padded sizes and M tiling.
    Cp = _round_up(Cout, 128)
    Kp = _round_up(K, 128)
    tile_m = min(1024, _round_up(M, 8))
    Mp = _round_up(M, tile_m)
    grid_m = Mp // tile_m

    # --- im2col glue (plain JAX), operands cast to bf16 for the MXU ---
    # TODO(synk): avoid materializing the 16x-expanded patches in HBM by accumulating
    # the 16 (kh, kw) taps inside the kernel from a space-to-depth view of the input.
    x_nhwc = jnp.transpose(x_nchw, (0, 2, 3, 1))
    xp = jnp.pad(x_nhwc, ((0, 0), (1, 1), (1, 1), (0, 0)))
    cols = []
    for kh in range(KH):
        for kw in range(KW):
            cols.append(xp[:, kh:kh + 2 * OH:2, kw:kw + 2 * OW:2, :])  # (N, OH, OW, Cin)
    patches = jnp.stack(cols, axis=-2).reshape(M, K).astype(jnp.bfloat16)
    patches = jnp.pad(patches, ((0, Mp - M), (0, Kp - K)))             # (Mp, Kp) bf16

    # weight (Cout, Cin, KH, KW) -> (KH, KW, Cin, Cout) -> (K, Cout), matching patch order.
    w2d = jnp.transpose(weight_oihw, (2, 3, 1, 0)).reshape(K, Cout).astype(jnp.bfloat16)
    w2d = jnp.pad(w2d, ((0, Kp - K), (0, Cp - Cout)))                  # (Kp, Cp) bf16
    b2d = jnp.pad(bias.astype(jnp.float32), (0, Cp - Cout)).reshape(1, Cp)

    # --- Pass 1: tiled matmul + bias + global channel sum/sumsq accumulation ---
    cost1 = pl.CostEstimate(
        flops=2 * Mp * Kp * Cp,
        transcendentals=0,
        bytes_accessed=Mp * Kp * 2 + Kp * Cp * 2 + Mp * Cp * 4,
    )
    y_flat, ch_sum, ch_sq = pl.pallas_call(
        _make_matmul_stats_kernel(tile_m, M),
        out_shape=(
            jax.ShapeDtypeStruct((Mp, Cp), jnp.float32),   # conv + bias output
            jax.ShapeDtypeStruct((1, Cp), jnp.float32),    # per-channel sum
            jax.ShapeDtypeStruct((1, Cp), jnp.float32),    # per-channel sum of squares
        ),
        grid_spec=pl.GridSpec(
            grid=(grid_m,),
            in_specs=[
                pl.BlockSpec((tile_m, Kp), lambda i: (i, 0)),
                pl.BlockSpec((Kp, Cp), lambda i: (0, 0)),
                pl.BlockSpec((1, Cp), lambda i: (0, 0)),
            ],
            out_specs=(
                pl.BlockSpec((tile_m, Cp), lambda i: (i, 0)),
                pl.BlockSpec((1, Cp), lambda i: (0, 0)),   # resident accumulator
                pl.BlockSpec((1, Cp), lambda i: (0, 0)),   # resident accumulator
            ),
        ),
        compiler_params=pltpu.CompilerParams(dimension_semantics=("arbitrary",)),
        cost_estimate=cost1,
    )(patches, w2d, b2d)

    # --- BatchNorm train-mode batch statistics (global over M), tiny per-channel math ---
    mean = ch_sum[0] / M
    var = jnp.maximum(ch_sq[0] / M - mean * mean, 0.0)     # biased variance
    gamma_p = jnp.pad(gamma.astype(jnp.float32), (0, Cp - Cout))
    beta_p = jnp.pad(beta.astype(jnp.float32), (0, Cp - Cout))
    scale = gamma_p * jax.lax.rsqrt(var + EPS)             # (Cp,)
    shift = beta_p - mean * scale                          # (Cp,)
    scale2d = scale.reshape(1, Cp)
    shift2d = shift.reshape(1, Cp)

    # --- Pass 2: elementwise normalize + affine + LeakyReLU ---
    cost2 = pl.CostEstimate(
        flops=3 * Mp * Cp,
        transcendentals=0,
        bytes_accessed=2 * Mp * Cp * 4,
    )
    out_flat = pl.pallas_call(
        _bn_lrelu_kernel,
        out_shape=jax.ShapeDtypeStruct((Mp, Cp), jnp.float32),
        grid_spec=pl.GridSpec(
            grid=(grid_m,),
            in_specs=[
                pl.BlockSpec((tile_m, Cp), lambda i: (i, 0)),
                pl.BlockSpec((1, Cp), lambda i: (0, 0)),
                pl.BlockSpec((1, Cp), lambda i: (0, 0)),
            ],
            out_specs=pl.BlockSpec((tile_m, Cp), lambda i: (i, 0)),
        ),
        compiler_params=pltpu.CompilerParams(dimension_semantics=("parallel",)),
        cost_estimate=cost2,
    )(y_flat, scale2d, shift2d)

    # strip padding, back to NCHW
    out = out_flat[:M, :Cout].reshape(N, OH, OW, Cout)
    return jnp.transpose(out, (0, 3, 1, 2))


def _reference(x, w, b, gamma, beta):
    # Reference with the same bf16 operand quantization as the kernel (f32 accumulation).
    xb = x.astype(jnp.bfloat16).astype(jnp.float32)
    wb = w.astype(jnp.bfloat16).astype(jnp.float32)
    y = jax.lax.conv_general_dilated(
        xb, wb, window_strides=(2, 2), padding=((1, 1), (1, 1)),
        dimension_numbers=("NCHW", "OIHW", "NCHW"))
    y = y + b[None, :, None, None]
    mean = jnp.mean(y, axis=(0, 2, 3), keepdims=True)
    var = jnp.mean((y - mean) ** 2, axis=(0, 2, 3), keepdims=True)
    y_hat = (y - mean) * jax.lax.rsqrt(var + EPS)
    z = y_hat * gamma[None, :, None, None] + beta[None, :, None, None]
    return jnp.where(z >= 0, z, NEG_SLOPE * z)


if __name__ == "__main__":
    key = jax.random.PRNGKey(0)
    k_x, k_w, k_b = jax.random.split(key, 3)

    N, Cin, H, W = 2, 4, 16, 16
    Cout = 8

    x = jax.random.normal(k_x, (N, Cin, H, W), dtype=jnp.float32)

    # Deterministic parameter init (kaiming-uniform-ish bound, like PyTorch defaults).
    fan_in = Cin * 4 * 4
    bound = 1.0 / jnp.sqrt(fan_in)
    weight = jax.random.uniform(k_w, (Cout, Cin, 4, 4), jnp.float32, -bound, bound)
    bias = jax.random.uniform(k_b, (Cout,), jnp.float32, -bound, bound)
    gamma = jnp.ones((Cout,), jnp.float32)   # BatchNorm2d default
    beta = jnp.zeros((Cout,), jnp.float32)   # BatchNorm2d default

    out = jax.block_until_ready(pyramidconv2d(x, weight, bias, gamma, beta))
    ref = jax.block_until_ready(_reference(x, weight, bias, gamma, beta))

    assert out.shape == (N, Cout, H // 2, W // 2), out.shape
    err = float(jnp.max(jnp.abs(out - ref)))
    assert jnp.allclose(out, ref, atol=1e-2, rtol=1e-2), err
    print("KERNEL_OK")
</pallas_src>

<mosaic_0001>
module attributes {stable_mosaic.version = 11 : i64} {
  func.func @kernel(%arg0: i32, %arg1: memref<128x128xbf16, #tpu.memory_space<vmem>>, %arg2: memref<128x128xbf16, #tpu.memory_space<vmem>>, %arg3: memref<1x128xf32, #tpu.memory_space<vmem>>, %arg4: memref<128x128xf32, #tpu.memory_space<vmem>>, %arg5: memref<1x128xf32, #tpu.memory_space<vmem>>, %arg6: memref<1x128xf32, #tpu.memory_space<vmem>>) attributes {dimension_semantics = [#tpu.dimension_semantics<arbitrary>], iteration_bounds = array<i64: 1>, scalar_prefetch = 0 : i64, scratch_operands = 0 : i64, tpu.core_type = #tpu.core_type<tc>, window_params = [{transform_indices = @transform_0, window_bounds = array<i64: 128, 128>}, {pipeline_mode = #tpu.pipeline_mode<synchronous>, transform_indices = @transform_1, window_bounds = array<i64: 128, 128>}, {pipeline_mode = #tpu.pipeline_mode<synchronous>, transform_indices = @transform_2, window_bounds = array<i64: 1, 128>}, {transform_indices = @transform_3, window_bounds = array<i64: 128, 128>}, {pipeline_mode = #tpu.pipeline_mode<synchronous>, transform_indices = @transform_4, window_bounds = array<i64: 1, 128>}, {pipeline_mode = #tpu.pipeline_mode<synchronous>, transform_indices = @transform_5, window_bounds = array<i64: 1, 128>}]} {
    %c0_i32 = arith.constant 0 : i32
    %0 = arith.cmpi eq, %arg0, %c0_i32 : i32
    %1 = arith.extui %0 : i1 to i32
    %c0_i32_0 = arith.constant 0 : i32
    %2 = arith.cmpi ne, %1, %c0_i32_0 : i32
    scf.if %2 {
      %cst_20 = arith.constant 0.000000e+00 : f32
      %29 = vector.broadcast %cst_20 : f32 to vector<1x128xf32>
      %c0_21 = arith.constant 0 : index
      %c0_22 = arith.constant 0 : index
      %30 = vector.load %arg5[%c0_21, %c0_22] : memref<1x128xf32, #tpu.memory_space<vmem>>, vector<1x128xf32>
      tpu.vector_store %arg5[%c0_21, %c0_22], %29 {strides = array<i32>} : memref<1x128xf32, #tpu.memory_space<vmem>>, vector<1x128xf32>,
      %cst_23 = arith.constant 0.000000e+00 : f32
      %31 = vector.broadcast %cst_23 : f32 to vector<1x128xf32>
      %c0_24 = arith.constant 0 : index
      %c0_25 = arith.constant 0 : index
      %32 = vector.load %arg6[%c0_24, %c0_25] : memref<1x128xf32, #tpu.memory_space<vmem>>, vector<1x128xf32>
      tpu.vector_store %arg6[%c0_24, %c0_25], %31 {strides = array<i32>} : memref<1x128xf32, #tpu.memory_space<vmem>>, vector<1x128xf32>,
    } else {
    }
    %c0 = arith.constant 0 : index
    %c0_1 = arith.constant 0 : index
    %3 = vector.load %arg1[%c0, %c0_1] : memref<128x128xbf16, #tpu.memory_space<vmem>>, vector<128x128xbf16>
    %c0_2 = arith.constant 0 : index
    %c0_3 = arith.constant 0 : index
    %4 = vector.load %arg2[%c0_2, %c0_3] : memref<128x128xbf16, #tpu.memory_space<vmem>>, vector<128x128xbf16>
    %cst = arith.constant dense<0.000000e+00> : vector<128x128xf32>
    %5 = tpu.matmul %3, %4, %cst {dimension_numbers = #tpu.dot_dimension_numbers<[1], [0], [0], [1], [0, 0, 1, 1], [], []>} : vector<128x128xbf16>, vector<128x128xbf16>, vector<128x128xf32> -> vector<128x128xf32>
    %c0_4 = arith.constant 0 : index
    %c0_5 = arith.constant 0 : index
    %6 = vector.load %arg3[%c0_4, %c0_5] : memref<1x128xf32, #tpu.memory_space<vmem>>, vector<1x128xf32>
    %7 = vector.broadcast %6 : vector<1x128xf32> to vector<128x128xf32>
    %8 = arith.addf %5, %7 : vector<128x128xf32>
    %c0_6 = arith.constant 0 : index
    %c0_7 = arith.constant 0 : index
    %9 = vector.load %arg4[%c0_6, %c0_7] : memref<128x128xf32, #tpu.memory_space<vmem>>, vector<128x128xf32>
    tpu.vector_store %arg4[%c0_6, %c0_7], %8 {strides = array<i32>} : memref<128x128xf32, #tpu.memory_space<vmem>>, vector<128x128xf32>,
    %c128_i32 = arith.constant 128 : i32
    %10 = arith.muli %arg0, %c128_i32 : i32
    %11 = tpu.iota {dimensions = array<i32: 0>} : vector<128x128xi32>
    %12 = vector.broadcast %10 : i32 to vector<128x128xi32>
    %13 = arith.addi %12, %11 : vector<128x128xi32>
    %c128_i32_8 = arith.constant 128 : i32
    %14 = vector.broadcast %c128_i32_8 : i32 to vector<128x128xi32>
    %15 = arith.cmpi slt, %13, %14 : vector<128x128xi32>
    %cst_9 = arith.constant 0.000000e+00 : f32
    %16 = vector.broadcast %cst_9 : f32 to vector<128x128xf32>
    %17 = arith.select %15, %8, %16 : vector<128x128xi1>, vector<128x128xf32>
    %c0_10 = arith.constant 0 : index
    %c0_11 = arith.constant 0 : index
    %18 = vector.load %arg5[%c0_10, %c0_11] : memref<1x128xf32, #tpu.memory_space<vmem>>, vector<1x128xf32>
    %cst_12 = arith.constant dense<0.000000e+00> : vector<128xf32>
    %19 = vector.multi_reduction <add>, %17, %cst_12 [0] : vector<128x128xf32> to vector<128xf32>
    %20 = vector.shape_cast %19 : vector<128xf32> to vector<1x128xf32>
    %21 = arith.addf %18, %20 : vector<1x128xf32>
    %c0_13 = arith.constant 0 : index
    %c0_14 = arith.constant 0 : index
    %22 = vector.load %arg5[%c0_13, %c0_14] : memref<1x128xf32, #tpu.memory_space<vmem>>, vector<1x128xf32>
    tpu.vector_store %arg5[%c0_13, %c0_14], %21 {strides = array<i32>} : memref<1x128xf32, #tpu.memory_space<vmem>>, vector<1x128xf32>,
    %c0_15 = arith.constant 0 : index
    %c0_16 = arith.constant 0 : index
    %23 = vector.load %arg6[%c0_15, %c0_16] : memref<1x128xf32, #tpu.memory_space<vmem>>, vector<1x128xf32>
    %24 = arith.mulf %17, %17 : vector<128x128xf32>
    %cst_17 = arith.constant dense<0.000000e+00> : vector<128xf32>
    %25 = vector.multi_reduction <add>, %24, %cst_17 [0] : vector<128x128xf32> to vector<128xf32>
    %26 = vector.shape_cast %25 : vector<128xf32> to vector<1x128xf32>
    %27 = arith.addf %23, %26 : vector<1x128xf32>
    %c0_18 = arith.constant 0 : index
    %c0_19 = arith.constant 0 : index
    %28 = vector.load %arg6[%c0_18, %c0_19] : memref<1x128xf32, #tpu.memory_space<vmem>>, vector<1x128xf32>
    tpu.vector_store %arg6[%c0_18, %c0_19], %27 {strides = array<i32>} : memref<1x128xf32, #tpu.memory_space<vmem>>, vector<1x128xf32>,
    return
  }
  func.func @transform_0(%arg0: i32) -> (i32, i32) {
    %c0_i32 = arith.constant 0 : i32
    %c0_i32_0 = arith.constant 0 : i32
    return %arg0, %c0_i32 : i32, i32
  }
  func.func @transform_1(%arg0: i32) -> (i32, i32) {
    %c0_i32 = arith.constant 0 : i32
    %c0_i32_0 = arith.constant 0 : i32
    %c0_i32_1 = arith.constant 0 : i32
    return %c0_i32, %c0_i32_0 : i32, i32
  }
  func.func @transform_2(%arg0: i32) -> (i32, i32) {
    %c0_i32 = arith.constant 0 : i32
    %c0_i32_0 = arith.constant 0 : i32
    %c0_i32_1 = arith.constant 0 : i32
    return %c0_i32, %c0_i32_0 : i32, i32
  }
  func.func @transform_3(%arg0: i32) -> (i32, i32) {
    %c0_i32 = arith.constant 0 : i32
    %c0_i32_0 = arith.constant 0 : i32
    return %arg0, %c0_i32 : i32, i32
  }
  func.func @transform_4(%arg0: i32) -> (i32, i32) {
    %c0_i32 = arith.constant 0 : i32
    %c0_i32_0 = arith.constant 0 : i32
    %c0_i32_1 = arith.constant 0 : i32
    return %c0_i32, %c0_i32_0 : i32, i32
  }
  func.func @transform_5(%arg0: i32) -> (i32, i32) {
    %c0_i32 = arith.constant 0 : i32
    %c0_i32_0 = arith.constant 0 : i32
    %c0_i32_1 = arith.constant 0 : i32
    return %c0_i32, %c0_i32_0 : i32, i32
  }
}

</mosaic_0001>

<bundles_post_ra>
// kernel: tpu_custom_call.1
= control target key start
LH: loop header
LB: loop body
LE: loop exit
PB: predicated region body
PF: predicated region fallthrough
CT: control target
= control target key end

     0   :  { %11 = vsyncpa [#allocation3], 0  ;;  %s851_s0 = inlined_call_operand.hbm [shape: bf16[128,128], index: 0, kind: input, shape index: {}]   ;;  %s852_s1 = inlined_call_operand.hbm [shape: bf16[128,128], index: 1, kind: input, shape index: {}]   ;;  %s853_s2 = inlined_call_operand.vmem [shape: f32[1,128], index: 2, kind: input, shape index: {}]   ;;  %s854_s3 = inlined_call_operand.hbm [shape: f32[128,128], index: 3, kind: output, shape index: {0}]   ;;  %s855_s4 = inlined_call_operand.hbm [shape: f32[1,128], index: 4, kind: output, shape index: {1}]   ;;  %s856_s5 = inlined_call_operand.hbm [shape: f32[1,128], index: 5, kind: output, shape index: {2}]  }
   0x1   :  { %12 = vsyncpa [#allocation6], 0 }
   0x2   :  { %13 = vsyncpa [#allocation4], 0 }
   0x3   :  { %14 = vsyncpa [#allocation9], 0  ;;  %s703_s18 = smov [#allocation2]   ;;  %s585_s22 = scalar_lea.hbm %s851_s0, 1024 }
   0x4   :  { %s20_s19 = sshll.u32 %s703_s18, 4  ;;  %p586_p0 = scmp.ne.s32.totalorder %s851_s0, %s585_s22  ;;  %s21_s19 = int_to_ptr.vmem [resolvable:$true] %s20_s19 }
   0x5   :  { %p589_p1 = scmp.lt.u32.totalorder %s585_s22, %s851_s0 }
   0x7   :  { %p591_p2 = pnand %p589_p1, %p586_p0 }
   0x9   :  { %594 = shalt.err (!%p591_p2)
}
   0xa   :  { %s595_s27 = scalar_lea.vmem %s21_s19, 1024  ;;  %p600_p4 = scmp.lt.s32.totalorder %s21_s19, %s21_s19 }
   0xb   :  { %p596_p3 = scmp.ne.s32.totalorder %s21_s19, %s595_s27  ;;  %p601_p5 = scmp.lt.s32.totalorder %s595_s27, %s595_s27 }
   0xd   :  { %p602_p6 = por %p601_p5, %p600_p4 }
   0xf   :  { %p603_p7 = pnand %p602_p6, %p596_p3 }
  0x11   :  { %606 = shalt.err (!%p603_p7)
}
  0x12   :  { %s704_s28 = smov 64   ;;  %s705_s29 = smov 4  }
  0x13   :  { %26 = dma.hbm_to_vmem [thread:$0]  %s851_s0, 1024, %s21_s19, [#allocation3], %s704_s28, %s704_s28, %s705_s29  }
  0x14   :  { %s706_s7 = smov [#allocation5]   ;;  %s607_s11 = scalar_lea.hbm %s852_s1, 1024 }
  0x15   :  { %s32_s8 = sshll.u32 %s706_s7, 4  ;;  %p608_p8 = scmp.ne.s32.totalorder %s852_s1, %s607_s11  ;;  %s33_s8 = int_to_ptr.vmem [resolvable:$true] %s32_s8 }
  0x16   :  { %p611_p9 = scmp.lt.u32.totalorder %s607_s11, %s852_s1 }
  0x18   :  { %p613_p10 = pnand %p611_p9, %p608_p8 }
  0x1a   :  { %616 = shalt.err (!%p613_p10)
}
  0x1b   :  { %s617_s16 = scalar_lea.vmem %s33_s8, 1024  ;;  %p622_p12 = scmp.lt.s32.totalorder %s33_s8, %s33_s8 }
  0x1c   :  { %p618_p11 = scmp.ne.s32.totalorder %s33_s8, %s617_s16  ;;  %p623_p13 = scmp.lt.s32.totalorder %s617_s16, %s617_s16 }
  0x1e   :  { %p624_p0 = por %p623_p13, %p622_p12 }
  0x20   :  { %p625_p1 = pnand %p624_p0, %p618_p11 }
  0x22   :  { %628 = shalt.err (!%p625_p1)
}
  0x23   :  { %38 = dma.hbm_to_vmem [thread:$0]  %s852_s1, 1024, %s33_s8, [#allocation6], %s704_s28, %s704_s28, %s705_s29  }
  0x24   :  { %695 = dma.done.wait [#allocation3], 1024  }
  0x25   :  { %696 = vsyncadd [#allocation3], 4294966272 }
  0x26   :  { %697 = dma.done.wait [#allocation6], 1024  }
  0x27   :  { %698 = vsyncadd [#allocation6], 4294966272  ;;  %v569_v0 = vld [vmem:[#allocation5] sm:$0xff]   ;;  %v570_v1 = vld [vmem:[#allocation5 + $0x8] sm:$0xff]   ;;  %v707_v16 = vmov 0.0  }
  0x28   :  { %511 = vmatprep.subr.bf16.mxu0 %v569_v0  ;;  %543 = vmatprep.subr.bf16.mxu1 %v569_v0  ;;  %v571_v2 = vld [vmem:[#allocation5 + $0x10] sm:$0xff]   ;;  %v572_v3 = vld [vmem:[#allocation5 + $0x18] sm:$0xff]   ;;  %v577_v4 = vld [vmem:[#allocation2] sm:$0xff]   ;;  %52 = vst [vmem:[#allocation8] sm:$0x1] %v707_v16 }
  0x29   :  { %512 = vmatpush3.bf16.msra.mxu0 %v569_v0  ;;  %551 = vmatpush3.bf16.msra.mxu1 %v569_v0  ;;  %v573_v5 = vld [vmem:[#allocation5 + $0x20] sm:$0xff]   ;;  %v574_v7 = vld [vmem:[#allocation5 + $0x28] sm:$0xff]   ;;  %v575_v8 = vld [vmem:[#allocation5 + $0x30] sm:$0xff]   ;;  %53 = vst [vmem:[#allocation10] sm:$0x1] %v707_v16 }
  0x2a   :  { %513 = vmatprep.subr.bf16.mxu0 %v570_v1  ;;  %544 = vmatprep.subr.bf16.mxu1 %v570_v1  ;;  %v581_v6 = vld [vmem:[#allocation2 + $0x20] sm:$0xff]   ;;  %v576_v9 = vld [vmem:[#allocation5 + $0x38] sm:$0xff]   ;;  %v578_v10 = vld [vmem:[#allocation2 + $0x8] sm:$0xff]  }
  0x2b   :  { %527 = vmatprep.mubr.bf16.mxu0 %v577_v4  ;;  %535 = vmatprep.mubr.bf16.mxu1 %v581_v6  ;;  %v582_v11 = vld [vmem:[#allocation2 + $0x28] sm:$0xff]   ;;  %v579_v12 = vld [vmem:[#allocation2 + $0x10] sm:$0xff]   ;;  %v580_v14 = vld [vmem:[#allocation2 + $0x18] sm:$0xff]  }
  0x2c   :  { %v583_v13 = vld [vmem:[#allocation2 + $0x30] sm:$0xff]   ;;  %v584_v15 = vld [vmem:[#allocation2 + $0x38] sm:$0xff]   ;;  %v478_v17 = vld [vmem:[%s853_s2] ss:$0 sm:$0xff]  ;;  %s708_s2 = smov [#allocation7]  }
  0x2d   :  { %514 = vmatpush3.bf16.msra.mxu0 %v570_v1  ;;  %552 = vmatpush3.bf16.msra.mxu1 %v570_v1  ;;  %s438_s19 = sshll.u32 %s708_s2, 4  ;;  %s785_s19 = int_to_ptr.vmem [resolvable:$true] %s438_s19 }
  0x2e   :  { %515 = vmatprep.subr.bf16.mxu0 %v571_v2  ;;  %545 = vmatprep.subr.bf16.mxu1 %v571_v2  ;;  %s629_s20 = scalar_lea.vmem %s785_s19, 2048  ;;  %p634_p3 = scmp.lt.s32.totalorder %s785_s19, %s785_s19 }
  0x2f   :  { %p630_p2 = scmp.ne.s32.totalorder %s785_s19, %s629_s20  ;;  %p635_p4 = scmp.lt.s32.totalorder %s629_s20, %s629_s20 }
  0x31   :  { %516 = vmatpush3.bf16.msra.mxu0 %v571_v2  ;;  %553 = vmatpush3.bf16.msra.mxu1 %v571_v2  ;;  %p636_p5 = por %p635_p4, %p634_p3 }
  0x32   :  { %517 = vmatprep.subr.bf16.mxu0 %v572_v3  ;;  %546 = vmatprep.subr.bf16.mxu1 %v572_v3 }
  0x33   :  { %p637_p6 = pnand %p636_p5, %p630_p2 }
  0x35   :  { %518 = vmatpush3.bf16.msra.mxu0 %v572_v3  ;;  %554 = vmatpush3.bf16.msra.mxu1 %v572_v3 }
  0x36   :  { %519 = vmatprep.subr.bf16.mxu0 %v573_v5  ;;  %547 = vmatprep.subr.bf16.mxu1 %v573_v5 }
  0x39   :  { %520 = vmatpush3.bf16.msra.mxu0 %v573_v5  ;;  %555 = vmatpush3.bf16.msra.mxu1 %v573_v5 }
  0x3a   :  { %521 = vmatprep.subr.bf16.mxu0 %v574_v7  ;;  %548 = vmatprep.subr.bf16.mxu1 %v574_v7 }
  0x3d   :  { %522 = vmatpush3.bf16.msra.mxu0 %v574_v7  ;;  %556 = vmatpush3.bf16.msra.mxu1 %v574_v7 }
  0x3e   :  { %523 = vmatprep.subr.bf16.mxu0 %v575_v8  ;;  %549 = vmatprep.subr.bf16.mxu1 %v575_v8 }
  0x41   :  { %524 = vmatpush3.bf16.msra.mxu0 %v575_v8  ;;  %557 = vmatpush3.bf16.msra.mxu1 %v575_v8 }
  0x42   :  { %525 = vmatprep.subr.bf16.mxu0 %v576_v9  ;;  %550 = vmatprep.subr.bf16.mxu1 %v576_v9 }
  0x45   :  { %526 = vmatpush3.bf16.msra.mxu0 %v576_v9  ;;  %558 = vmatpush3.bf16.msra.mxu1 %v576_v9 }
  0x48   :  { %528 = vmatmul.mubr.bf16.vlgmr.msra.gmra.mrb[0].mxu0 %v578_v10  ;;  %536 = vmatmul.mubr.bf16.vlgmr.msra.gmra.mrb[0].mxu1 %v582_v11 }
  0x49   :  { %531 = vmatprep.mubr.bf16.mxu0 %v579_v12  ;;  %539 = vmatprep.mubr.bf16.mxu1 %v583_v13 }
  0x50   :  { %532 = vmatmul.mubr.bf16.gmra.mrb[4].mxu0 %v580_v14  ;;  %540 = vmatmul.mubr.bf16.gmra.mrb[4].mxu1 %v584_v15 }
 0x11b   :  { %v529_v18 = vpop.f32.mrb[0].mxu0  ;;  %v537_v19 = vpop.f32.mrb[0].mxu1 }
 0x11c   :  { %v232_v20 = vadd.f32 %v529_v18, %v478_v17  ;;  %v223_v21 = vpop.f32.mrb[1].mxu0  ;;  %v770_v22 = vadd.f32 %v537_v19, %v478_v17  ;;  %v255_v23 = vpop.f32.mrb[1].mxu1 }
 0x11d   :  { %v224_v24 = vadd.f32 %v478_v17, %v223_v21  ;;  %v530_v25 = vpop.f32.mrb[2].mxu0  ;;  %v772_v26 = vadd.f32 %v478_v17, %v255_v23  ;;  %v538_v27 = vpop.f32.mrb[2].mxu1 }
 0x11e   :  { %288 = vst [vmem:[#allocation7 + $0x10] sm:$0xff] %v232_v20  ;;  %v235_v28 = vadd.f32 %v530_v25, %v478_v17  ;;  %v226_v29 = vpop.f32.mrb[3].mxu0  ;;  %296 = vst [vmem:[#allocation7 + $0x50] sm:$0xff] %v770_v22  ;;  %v775_v30 = vadd.f32 %v538_v27, %v478_v17  ;;  %v258_v31 = vpop.f32.mrb[3].mxu1  ;;  %v396_v37 = vmul.f32 %v232_v20, %v232_v20 }
 0x11f   :  { %286 = vst [vmem:[#allocation7] sm:$0xff] %v224_v24  ;;  %v227_v32 = vadd.f32 %v478_v17, %v226_v29  ;;  %294 = vst [vmem:[#allocation7 + $0x40] sm:$0xff] %v772_v26  ;;  %v778_v33 = vadd.f32 %v478_v17, %v258_v31  ;;  %v394_v34 = vmul.f32 %v224_v24, %v224_v24 }
 0x120   :  { %289 = vst [vmem:[#allocation7 + $0x18] sm:$0xff] %v235_v28  ;;  %297 = vst [vmem:[#allocation7 + $0x58] sm:$0xff] %v775_v30  ;;  %v397_v42 = vmul.f32 %v235_v28, %v235_v28 }
 0x121   :  { %287 = vst [vmem:[#allocation7 + $0x8] sm:$0xff] %v227_v32  ;;  %v370_v35 = vadd.f32 %v227_v32, %v224_v24  ;;  %v395_v36 = vmul.f32 %v227_v32, %v227_v32  ;;  %295 = vst [vmem:[#allocation7 + $0x48] sm:$0xff] %v778_v33 }
 0x123   :  { %v371_v38 = vadd.f32 %v370_v35, %v232_v20  ;;  %v410_v39 = vadd.f32 %v395_v36, %v394_v34  ;;  %v533_v40 = vpop.f32.mrb[4].mxu0  ;;  %v541_v41 = vpop.f32.mrb[4].mxu1 }
 0x124   :  { %v248_v43 = vadd.f32 %v533_v40, %v478_v17  ;;  %v239_v44 = vpop.f32.mrb[5].mxu0  ;;  %v782_v45 = vadd.f32 %v541_v41, %v478_v17  ;;  %v271_v46 = vpop.f32.mrb[5].mxu1 }
 0x125   :  { %v411_v47 = vadd.f32 %v410_v39, %v396_v37  ;;  %v240_v48 = vadd.f32 %v478_v17, %v239_v44  ;;  %v372_v49 = vadd.f32 %v371_v38, %v235_v28  ;;  %v534_v50 = vpop.f32.mrb[6].mxu0  ;;  %v272_v51 = vadd.f32 %v478_v17, %v271_v46  ;;  %v542_v52 = vpop.f32.mrb[6].mxu1 }
 0x126   :  { %292 = vst [vmem:[#allocation7 + $0x30] sm:$0xff] %v248_v43  ;;  %v251_v53 = vadd.f32 %v534_v50, %v478_v17  ;;  %v242_v54 = vpop.f32.mrb[7].mxu0  ;;  %300 = vst [vmem:[#allocation7 + $0x70] sm:$0xff] %v782_v45  ;;  %v283_v55 = vadd.f32 %v542_v52, %v478_v17  ;;  %v274_v56 = vpop.f32.mrb[7].mxu1  ;;  %v400_v1 = vmul.f32 %v248_v43, %v248_v43 }
 0x127   :  { %290 = vst [vmem:[#allocation7 + $0x20] sm:$0xff] %v240_v48  ;;  %v373_v57 = vadd.f32 %v372_v49, %v240_v48  ;;  %v398_v58 = vmul.f32 %v240_v48, %v240_v48  ;;  %v412_v59 = vadd.f32 %v411_v47, %v397_v42  ;;  %v243_v60 = vadd.f32 %v478_v17, %v242_v54 }
 0x128   :  { %298 = vst [vmem:[#allocation7 + $0x60] sm:$0xff] %v272_v51  ;;  %293 = vst [vmem:[#allocation7 + $0x38] sm:$0xff] %v251_v53  ;;  %v275_v61 = vadd.f32 %v478_v17, %v274_v56 }
 0x129   :  { %301 = vst [vmem:[#allocation7 + $0x78] sm:$0xff] %v283_v55  ;;  %v413_v62 = vadd.f32 %v412_v59, %v398_v58  ;;  %291 = vst [vmem:[#allocation7 + $0x28] sm:$0xff] %v243_v60  ;;  %v374_v63 = vadd.f32 %v373_v57, %v243_v60  ;;  %v399_v0 = vmul.f32 %v243_v60, %v243_v60 }
 0x12a   :  { %299 = vst [vmem:[#allocation7 + $0x68] sm:$0xff] %v275_v61 }
 0x12b   :  { %v375_v2 = vadd.f32 %v374_v63, %v248_v43  ;;  %v414_v3 = vadd.f32 %v413_v62, %v399_v0 }
 0x12c   :  { %640 = shalt.err (!%p637_p6)
}
 0x12d   :  { %s641_s23 = scalar_lea.hbm %s854_s3, 2048 }
 0x12e   :  { %p642_p7 = scmp.ne.s32.totalorder %s854_s3, %s641_s23  ;;  %p645_p8 = scmp.lt.u32.totalorder %s641_s23, %s854_s3 }
 0x130   :  { %p647_p9 = pnand %p645_p8, %p642_p7 }
 0x132   :  { %650 = shalt.err (!%p647_p9)
}
 0x133   :  { %s709_s28 = smov 128   ;;  %s710_s29 = smov 8   ;;  %v401_v4 = vmul.f32 %v251_v53, %v251_v53  ;;  %v415_v5 = vadd.f32 %v414_v3, %v400_v1  ;;  %v376_v6 = vadd.f32 %v375_v2, %v251_v53  ;;  %v402_v7 = vmul.f32 %v772_v26, %v772_v26  ;;  %v369_v41 = vld [vmem:[#allocation8] sm:$0x1]  ;;  %v393_v44 = vld [vmem:[#allocation10] sm:$0x1] }
 0x134   :  { %444 = dma.vmem_to_hbm [thread:$0]  %s785_s19, 2048, %s854_s3, [#allocation4], %s709_s28, %s709_s28, %s710_s29   ;;  %v403_v12 = vmul.f32 %v778_v33, %v778_v33  ;;  %v404_v13 = vmul.f32 %v770_v22, %v770_v22  ;;  %v405_v16 = vmul.f32 %v775_v30, %v775_v30  ;;  %v406_v19 = vmul.f32 %v272_v51, %v272_v51 }
 0x135   :  { %v377_v8 = vadd.f32 %v376_v6, %v772_v26  ;;  %v416_v9 = vadd.f32 %v415_v5, %v401_v4  ;;  %v407_v25 = vmul.f32 %v275_v61, %v275_v61  ;;  %v408_v26 = vmul.f32 %v782_v45, %v782_v45  ;;  %s711_s3 = smov [#allocation8]   ;;  %s712_s8 = smov [#allocation10]  }
 0x136   :  { %s451_s7 = sshll.u32 %s711_s3, 4  ;;  %s461_s9 = sshll.u32 %s712_s8, 4  ;;  %s452_s7 = int_to_ptr.vmem [resolvable:$true] %s451_s7  ;;  %s819_s9 = int_to_ptr.vmem [resolvable:$true] %s461_s9 }
 0x137   :  { %v417_v10 = vadd.f32 %v416_v9, %v402_v7  ;;  %v378_v11 = vadd.f32 %v377_v8, %v778_v33  ;;  %s651_s10 = scalar_lea.vmem %s452_s7, 16  ;;  %s655_s11 = scalar_lea.vmem %s452_s7, 32 }
 0x138   :  { %p652_p10 = scmp.ne.s32.totalorder %s452_s7, %s651_s10  ;;  %p656_p11 = scmp.lt.s32.totalorder %s452_s7, %s452_s7 }
 0x139   :  { %v379_v14 = vadd.f32 %v378_v11, %v770_v22  ;;  %v418_v15 = vadd.f32 %v417_v10, %v403_v12  ;;  %v409_v22 = vmul.f32 %v283_v55, %v283_v55  ;;  %p657_p12 = scmp.lt.s32.totalorder %s655_s11, %s651_s10 }
 0x13b   :  { %v419_v17 = vadd.f32 %v418_v15, %v404_v13  ;;  %v380_v18 = vadd.f32 %v379_v14, %v775_v30  ;;  %p658_p13 = por %p657_p12, %p656_p11 }
 0x13d   :  { %v381_v20 = vadd.f32 %v380_v18, %v272_v51  ;;  %v420_v21 = vadd.f32 %v419_v17, %v405_v16  ;;  %p659_p0 = pnand %p658_p13, %p652_p10 }
 0x13f   :  { %v421_v23 = vadd.f32 %v420_v21, %v406_v19  ;;  %v382_v24 = vadd.f32 %v381_v20, %v275_v61 }
 0x141   :  { %v383_v27 = vadd.f32 %v382_v24, %v782_v45  ;;  %v422_v28 = vadd.f32 %v421_v23, %v407_v25 }
 0x143   :  { %v384_v29 = vadd.f32 %v383_v27, %v283_v55  ;;  %v423_v31 = vadd.f32 %v422_v28, %v408_v26 }
 0x145   :  { %v385_v32 = vrot.slane %v384_v29, 4  ;;  %v424_v33 = vadd.f32 %v423_v31, %v409_v22 }
 0x147   :  { %v386_v34 = vadd.f32 %v385_v32, %v384_v29  ;;  %v425_v35 = vrot.slane %v424_v33, 4 }
 0x149   :  { %v426_v30 = vadd.f32 %v425_v35, %v424_v33  ;;  %v387_v36 = vrot.slane %v386_v34, 2 }
 0x14b   :  { %v388_v37 = vadd.f32 %v387_v36, %v386_v34  ;;  %v427_v38 = vrot.slane %v426_v30, 2 }
 0x14d   :  { %v389_v39 = vrot.slane %v388_v37, 1  ;;  %v428_v40 = vadd.f32 %v427_v38, %v426_v30 }
 0x14f   :  { %v390_v42 = vadd.f32 %v389_v39, %v388_v37  ;;  %v429_v43 = vrot.slane %v428_v40, 1 }
 0x151   :  { %v391_v45 = vadd.f32 %v390_v42, %v369_v41  ;;  %v430_v46 = vadd.f32 %v429_v43, %v428_v40 }
 0x153   :  { %392 = vst [vmem:[#allocation8] sm:$0x1] %v391_v45  ;;  %v431_v47 = vadd.f32 %v430_v46, %v393_v44 }
 0x154   :  { %662 = shalt.err (!%p659_p0)
}
 0x155   :  { %s663_s14 = scalar_lea.hbm %s855_s4, 16 }
 0x156   :  { %p664_p1 = scmp.ne.s32.totalorder %s855_s4, %s663_s14  ;;  %p667_p2 = scmp.lt.u32.totalorder %s663_s14, %s855_s4 }
 0x158   :  { %p669_p3 = pnand %p667_p2, %p664_p1 }
 0x15a   :  { %672 = shalt.err (!%p669_p3)
}
 0x15b   :  { %454 = dma.vmem_to_hbm [thread:$0]  %s452_s7, 16, %s855_s4, [#allocation9]   ;;  %432 = vst [vmem:[#allocation10] sm:$0x1] %v431_v47 }
 0x15c   :  { %s673_s2 = scalar_lea.vmem %s819_s9, 16  ;;  %s677_s19 = scalar_lea.vmem %s819_s9, 32 }
 0x15d   :  { %p674_p4 = scmp.ne.s32.totalorder %s819_s9, %s673_s2  ;;  %p678_p5 = scmp.lt.s32.totalorder %s819_s9, %s819_s9 }
 0x15e   :  { %p679_p6 = scmp.lt.s32.totalorder %s677_s19, %s673_s2 }
 0x160   :  { %p680_p7 = por %p679_p6, %p678_p5 }
 0x162   :  { %p681_p8 = pnand %p680_p7, %p674_p4 }
 0x164   :  { %684 = shalt.err (!%p681_p8)
}
 0x165   :  { %s685_s22 = scalar_lea.hbm %s856_s5, 16 }
 0x166   :  { %p686_p9 = scmp.ne.s32.totalorder %s856_s5, %s685_s22  ;;  %p689_p10 = scmp.lt.u32.totalorder %s685_s22, %s856_s5 }
 0x168   :  { %p691_p11 = pnand %p689_p10, %p686_p9 }
 0x16a   :  { %694 = shalt.err (!%p691_p11)
}
 0x16b   :  { %464 = dma.vmem_to_hbm [thread:$0]  %s819_s9, 16, %s856_s5, [#allocation9]  }
 0x16c   :  { %699 = dma.done.wait [#allocation4], 2048  }
 0x16d   :  { %700 = vsyncadd [#allocation4], 4294965248 }
 0x16e   :  { %701 = dma.done.wait [#allocation9], 32  }
 0x16f   :  { %702 = vsyncadd [#allocation9], 4294967264 }
 0x170   :  { %474 = vsyncpa [#allocation3], 1 }
 0x171   :  { %475 = vsyncpa [#allocation6], 1 }
 0x172   :  { %476 = vsyncpa [#allocation4], 1 }
 0x173   :  { %477 = vsyncpa [#allocation9], 1 }

</bundles_post_ra>
